<compile_context>
chip_gen: v7x
topology: tpu7x:2x2x1
jax: 0.10.0
libtpu: 0.0.40
codegen_flags: <defaults>
</compile_context>

<pallas_src>
import jax
import jax.numpy as jnp
import numpy as np
from jax.experimental import pallas as pl
from jax.experimental.pallas import tpu as pltpu


# --------------------------------------------------------------------------- #
# Kernel
# --------------------------------------------------------------------------- #
def _vrnn_kernel(z_ref, phi_x_ref, act_ref, h_prev_ref,
                 w_phi_ref, b_phi_ref,
                 w_x_ref, w_z_ref, w_a_ref, w_h_ref,
                 b_i_ref, b_h_ref,
                 out_ref):
    """One row-tile (TM rows of B*P) of the VRNN deterministic transition.

    Weight layout:
      w_phi : (z_dim, H)           bf16
      w_x   : (3, phi_x_dim, H)    bf16   gate-major [r, u, n], acts on phi_x
      w_z   : (3, H, H)            bf16   acts on phi_z
      w_a   : (3, A, H)            bf16   acts on encoded_action
      w_h   : (3, H, H)            bf16   acts on h_prev
      b_phi : (1, H)   b_i, b_h : (3, 1, H)   all f32
    """
    # ---- phi_z = ReLU(z @ W_phi + b_phi)  (bf16 MXU, f32 accumulate) -------
    phi_z = jnp.dot(z_ref[...], w_phi_ref[...],
                    preferred_element_type=jnp.float32)
    phi_z = jnp.maximum(phi_z + b_phi_ref[...], 0.0)
    phi_z_bf = phi_z.astype(jnp.bfloat16)

    px = phi_x_ref[...]                      # bf16
    act = act_ref[...]                       # bf16
    h_prev = h_prev_ref[...]                 # f32  (elementwise path)
    h_bf = h_prev.astype(jnp.bfloat16)       # bf16 (MXU path)

    # gi(g) = phi_x @ W_x[g] + phi_z @ W_z[g] + act @ W_a[g] + b_i[g]
    # -> replaces concat([phi_x, phi_z, act]) @ W_ih; every operand and every
    #    gate output is lane-aligned at 0.
    def gate_i(g):
        acc = jnp.dot(px, w_x_ref[g], preferred_element_type=jnp.float32)
        acc += jnp.dot(phi_z_bf, w_z_ref[g], preferred_element_type=jnp.float32)
        acc += jnp.dot(act, w_a_ref[g], preferred_element_type=jnp.float32)
        return acc + b_i_ref[g]

    def gate_h(g):
        return (jnp.dot(h_bf, w_h_ref[g], preferred_element_type=jnp.float32)
                + b_h_ref[g])

    r = jax.nn.sigmoid(gate_i(0) + gate_h(0))
    u = jax.nn.sigmoid(gate_i(1) + gate_h(1))
    n = jnp.tanh(gate_i(2) + r * gate_h(2))
    h_new = (1.0 - u) * n + u * h_prev

    # Single packed store [phi_z | h_new] -> one wider output DMA per tile.
    out_ref[...] = jnp.concatenate([phi_z, h_new], axis=-1)


# --------------------------------------------------------------------------- #
# Wrapper
# --------------------------------------------------------------------------- #
def _round_up(x, m):
    return ((x + m - 1) // m) * m


def _split_gru_params(params, phi_x_dim, h_dim):
    """Re-block PyTorch-style (in,3H)/(H,3H) GRU weights into per-gate,
    per-input-block arrays with a leading gate axis (r, u, n)."""
    H = h_dim
    w_ih = params["w_ih"]                       # (phi_x_dim + H + A, 3H)
    w_hh = params["w_hh"]                       # (H, 3H)
    b_ih = params["b_ih"].reshape(1, 3 * H)
    b_hh = params["b_hh"].reshape(1, 3 * H)

    def col_split(w):                           # (K, 3H) -> (3, K, H)
        return jnp.stack([w[:, g * H:(g + 1) * H] for g in range(3)], axis=0)

    w_x = col_split(w_ih[:phi_x_dim])                    # (3, phi_x_dim, H)
    w_z = col_split(w_ih[phi_x_dim:phi_x_dim + H])       # (3, H, H)
    w_a = col_split(w_ih[phi_x_dim + H:])                # (3, A, H)
    w_h = col_split(w_hh)                                # (3, H, H)
    b_i = col_split(b_ih)                                # (3, 1, H)
    b_h = col_split(b_hh)                                # (3, 1, H)
    return w_x, w_z, w_a, w_h, b_i, b_h


def vrnn_deterministic_transition(z, phi_x, encoded_action, h_prev, params):
    """z: (B,P,z_dim)  phi_x: (B,P,phi_x_dim)  encoded_action: (B,P,A)
       h_prev: (B,P,h_dim)  ->  (phi_z (B,P,h_dim), h (B,P,h_dim))"""
    B, P, z_dim = z.shape
    _, _, phi_x_dim = phi_x.shape
    _, _, A = encoded_action.shape
    _, _, H = h_prev.shape
    N = B * P

    # Row tile: large enough to feed the MXU, small enough to double-buffer
    # comfortably within v7x's 64 MiB VMEM.
    TM = 256 if N >= 256 else _round_up(N, 16)
    N_pad = _round_up(N, TM)

    def prep(a, d, dtype):
        a = a.reshape(N, d).astype(dtype)
        if N_pad != N:
            a = jnp.pad(a, ((0, N_pad - N), (0, 0)))
        return a

    z2 = prep(z, z_dim, jnp.bfloat16)
    px2 = prep(phi_x, phi_x_dim, jnp.bfloat16)
    a2 = prep(encoded_action, A, jnp.bfloat16)
    h2 = prep(h_prev, H, jnp.float32)          # f32: needed for (1-u)*n + u*h

    w_phi = params["w_phi"].astype(jnp.bfloat16)
    b_phi = params["b_phi"].reshape(1, H).astype(jnp.float32)
    w_x, w_z, w_a, w_h, b_i, b_h = _split_gru_params(params, phi_x_dim, H)
    w_x, w_z, w_a, w_h = [w.astype(jnp.bfloat16) for w in (w_x, w_z, w_a, w_h)]
    b_i = b_i.astype(jnp.float32)
    b_h = b_h.astype(jnp.float32)

    def row_spec(d):
        return pl.BlockSpec((TM, d), lambda i: (i, 0))

    def full_spec(arr):
        zeros = (0,) * arr.ndim
        return pl.BlockSpec(arr.shape, lambda i: zeros)   # VMEM-resident

    out = pl.pallas_call(
        _vrnn_kernel,
        out_shape=jax.ShapeDtypeStruct((N_pad, 2 * H), jnp.float32),
        grid_spec=pltpu.PrefetchScalarGridSpec(
            num_scalar_prefetch=0,
            grid=(N_pad // TM,),
            in_specs=[
                row_spec(z_dim), row_spec(phi_x_dim), row_spec(A), row_spec(H),
                full_spec(w_phi), full_spec(b_phi),
                full_spec(w_x), full_spec(w_z), full_spec(w_a), full_spec(w_h),
                full_spec(b_i), full_spec(b_h),
            ],
            out_specs=pl.BlockSpec((TM, 2 * H), lambda i: (i, 0)),
        ),
        compiler_params=pltpu.CompilerParams(
            dimension_semantics=("parallel",),
            vmem_limit_bytes=32 * 1024 * 1024,
        ),
    )(z2, px2, a2, h2, w_phi, b_phi, w_x, w_z, w_a, w_h, b_i, b_h)

    phi_z = out[:N, :H].reshape(B, P, H)
    h_new = out[:N, H:].reshape(B, P, H)
    return phi_z, h_new


# --------------------------------------------------------------------------- #
# Params + pure-JAX reference
# --------------------------------------------------------------------------- #
def init_params(key, z_dim, phi_x_dim, h_dim, action_encoding):
    """Deterministic synthetic params. Weights stored transposed (in, out);
    GRU input rows ordered [phi_x | phi_z | action], gate columns [r | u | n]."""
    in_dim = phi_x_dim + h_dim + action_encoding
    ks = jax.random.split(key, 6)
    scale = 0.1
    return {
        "w_phi": scale * jax.random.normal(ks[0], (z_dim, h_dim), jnp.float32),
        "b_phi": scale * jax.random.normal(ks[1], (1, h_dim), jnp.float32),
        "w_ih": scale * jax.random.normal(ks[2], (in_dim, 3 * h_dim), jnp.float32),
        "b_ih": scale * jax.random.normal(ks[3], (1, 3 * h_dim), jnp.float32),
        "w_hh": scale * jax.random.normal(ks[4], (h_dim, 3 * h_dim), jnp.float32),
        "b_hh": scale * jax.random.normal(ks[5], (1, 3 * h_dim), jnp.float32),
    }


def _reference(z, phi_x, act, h_prev, params):
    """Pure-f32 JAX reference matching PyTorch GRUCell semantics."""
    B, P, _ = z.shape
    H = h_prev.shape[-1]
    z2 = z.reshape(-1, z.shape[-1])
    phi_z = jax.nn.relu(z2 @ params["w_phi"] + params["b_phi"])
    x = jnp.concatenate([phi_x.reshape(-1, phi_x.shape[-1]),
                         phi_z,
                         act.reshape(-1, act.shape[-1])], axis=-1)
    h2 = h_prev.reshape(-1, H)
    gi = x @ params["w_ih"] + params["b_ih"]
    gh = h2 @ params["w_hh"] + params["b_hh"]
    r = jax.nn.sigmoid(gi[:, :H] + gh[:, :H])
    u = jax.nn.sigmoid(gi[:, H:2 * H] + gh[:, H:2 * H])
    n = jnp.tanh(gi[:, 2 * H:] + r * gh[:, 2 * H:])
    h_new = (1 - u) * n + u * h2
    return phi_z.reshape(B, P, H), h_new.reshape(B, P, H)


# --------------------------------------------------------------------------- #
# Demo / self-check
# --------------------------------------------------------------------------- #
if __name__ == "__main__":
    z_dim, phi_x_dim, h_dim, action_encoding = 8, 16, 32, 4
    key = jax.random.PRNGKey(0)
    k_p, key = jax.random.split(key)
    params = init_params(k_p, z_dim, phi_x_dim, h_dim, action_encoding)

    def run_case(key, B, P):
        k_z, k_x, k_a, k_h = jax.random.split(key, 4)
        z = jax.random.normal(k_z, (B, P, z_dim), jnp.float32)
        phi_x = jax.random.normal(k_x, (B, P, phi_x_dim), jnp.float32)
        enc_action = jax.random.normal(k_a, (B, P, action_encoding), jnp.float32)
        h_prev = jax.random.normal(k_h, (B, P, h_dim), jnp.float32)

        phi_z_out, h_out = vrnn_deterministic_transition(
            z, phi_x, enc_action, h_prev, params)
        jax.block_until_ready((phi_z_out, h_out))

        phi_z_ref, h_ref = _reference(z, phi_x, enc_action, h_prev, params)
        # bf16 MXU operands with f32 accumulation -> loosened tolerance.
        assert np.allclose(np.asarray(phi_z_out), np.asarray(phi_z_ref), atol=2e-2)
        assert np.allclose(np.asarray(h_out), np.asarray(h_ref), atol=2e-2)

    k1, k2 = jax.random.split(key)
    run_case(k1, B=2, P=8)      # tiny shape from the module's forward (grid=1)
    run_case(k2, B=4, P=96)     # exercises row tiling (TM=256) + row padding

    print("KERNEL_OK")
</pallas_src>

<mosaic_0001>
module attributes {stable_mosaic.version = 11 : i64} {
  func.func @_vrnn_kernel(%arg0: i32, %arg1: memref<16x8xbf16, #tpu.memory_space<vmem>>, %arg2: memref<16x16xbf16, #tpu.memory_space<vmem>>, %arg3: memref<16x4xbf16, #tpu.memory_space<vmem>>, %arg4: memref<16x32xf32, #tpu.memory_space<vmem>>, %arg5: memref<8x32xbf16, #tpu.memory_space<vmem>>, %arg6: memref<1x32xf32, #tpu.memory_space<vmem>>, %arg7: memref<3x16x32xbf16, #tpu.memory_space<vmem>>, %arg8: memref<3x32x32xbf16, #tpu.memory_space<vmem>>, %arg9: memref<3x4x32xbf16, #tpu.memory_space<vmem>>, %arg10: memref<3x32x32xbf16, #tpu.memory_space<vmem>>, %arg11: memref<3x1x32xf32, #tpu.memory_space<vmem>>, %arg12: memref<3x1x32xf32, #tpu.memory_space<vmem>>, %arg13: memref<16x64xf32, #tpu.memory_space<vmem>>) attributes {dimension_semantics = [#tpu.dimension_semantics<parallel>], iteration_bounds = array<i64: 1>, scalar_prefetch = 0 : i64, scratch_operands = 0 : i64, tpu.core_type = #tpu.core_type<tc>, window_params = [{transform_indices = @transform_0, window_bounds = array<i64: 16, 8>}, {transform_indices = @transform_1, window_bounds = array<i64: 16, 16>}, {transform_indices = @transform_2, window_bounds = array<i64: 16, 4>}, {transform_indices = @transform_3, window_bounds = array<i64: 16, 32>}, {pipeline_mode = #tpu.pipeline_mode<synchronous>, transform_indices = @transform_4, window_bounds = array<i64: 8, 32>}, {pipeline_mode = #tpu.pipeline_mode<synchronous>, transform_indices = @transform_5, window_bounds = array<i64: 1, 32>}, {pipeline_mode = #tpu.pipeline_mode<synchronous>, transform_indices = @transform_6, window_bounds = array<i64: 3, 16, 32>}, {pipeline_mode = #tpu.pipeline_mode<synchronous>, transform_indices = @transform_7, window_bounds = array<i64: 3, 32, 32>}, {pipeline_mode = #tpu.pipeline_mode<synchronous>, transform_indices = @transform_8, window_bounds = array<i64: 3, 4, 32>}, {pipeline_mode = #tpu.pipeline_mode<synchronous>, transform_indices = @transform_9, window_bounds = array<i64: 3, 32, 32>}, {pipeline_mode = #tpu.pipeline_mode<synchronous>, transform_indices = @transform_10, window_bounds = array<i64: 3, 1, 32>}, {pipeline_mode = #tpu.pipeline_mode<synchronous>, transform_indices = @transform_11, window_bounds = array<i64: 3, 1, 32>}, {transform_indices = @transform_12, window_bounds = array<i64: 16, 64>}]} {
    %c0 = arith.constant 0 : index
    %c0_0 = arith.constant 0 : index
    %0 = vector.load %arg1[%c0, %c0_0] : memref<16x8xbf16, #tpu.memory_space<vmem>>, vector<16x8xbf16>
    %c0_1 = arith.constant 0 : index
    %c0_2 = arith.constant 0 : index
    %1 = vector.load %arg5[%c0_1, %c0_2] : memref<8x32xbf16, #tpu.memory_space<vmem>>, vector<8x32xbf16>
    %cst = arith.constant dense<0.000000e+00> : vector<16x32xf32>
    %2 = tpu.matmul %0, %1, %cst {dimension_numbers = #tpu.dot_dimension_numbers<[1], [0], [0], [1], [0, 0, 1, 1], [], []>} : vector<16x8xbf16>, vector<8x32xbf16>, vector<16x32xf32> -> vector<16x32xf32>
    %c0_3 = arith.constant 0 : index
    %c0_4 = arith.constant 0 : index
    %3 = vector.load %arg6[%c0_3, %c0_4] : memref<1x32xf32, #tpu.memory_space<vmem>>, vector<1x32xf32>
    %4 = vector.broadcast %3 : vector<1x32xf32> to vector<16x32xf32>
    %5 = arith.addf %2, %4 : vector<16x32xf32>
    %cst_5 = arith.constant 0.000000e+00 : f32
    %6 = vector.broadcast %cst_5 : f32 to vector<16x32xf32>
    %7 = arith.maximumf %5, %6 : vector<16x32xf32>
    %8 = arith.truncf %7 : vector<16x32xf32> to vector<16x32xbf16>
    %c0_6 = arith.constant 0 : index
    %c0_7 = arith.constant 0 : index
    %9 = vector.load %arg2[%c0_6, %c0_7] : memref<16x16xbf16, #tpu.memory_space<vmem>>, vector<16x16xbf16>
    %c0_8 = arith.constant 0 : index
    %c0_9 = arith.constant 0 : index
    %10 = vector.load %arg3[%c0_8, %c0_9] : memref<16x4xbf16, #tpu.memory_space<vmem>>, vector<16x4xbf16>
    %c0_10 = arith.constant 0 : index
    %c0_11 = arith.constant 0 : index
    %11 = vector.load %arg4[%c0_10, %c0_11] : memref<16x32xf32, #tpu.memory_space<vmem>>, vector<16x32xf32>
    %12 = arith.truncf %11 : vector<16x32xf32> to vector<16x32xbf16>
    %c0_12 = arith.constant 0 : index
    %c0_13 = arith.constant 0 : index
    %c0_14 = arith.constant 0 : index
    %13 = vector.load %arg7[%c0_12, %c0_13, %c0_14] : memref<3x16x32xbf16, #tpu.memory_space<vmem>>, vector<1x16x32xbf16>
    %14 = vector.shape_cast %13 : vector<1x16x32xbf16> to vector<16x32xbf16>
    %cst_15 = arith.constant dense<0.000000e+00> : vector<16x32xf32>
    %15 = tpu.matmul %9, %14, %cst_15 {dimension_numbers = #tpu.dot_dimension_numbers<[1], [0], [0], [1], [0, 0, 1, 1], [], []>} : vector<16x16xbf16>, vector<16x32xbf16>, vector<16x32xf32> -> vector<16x32xf32>
    %c0_16 = arith.constant 0 : index
    %c0_17 = arith.constant 0 : index
    %c0_18 = arith.constant 0 : index
    %16 = vector.load %arg8[%c0_16, %c0_17, %c0_18] : memref<3x32x32xbf16, #tpu.memory_space<vmem>>, vector<1x32x32xbf16>
    %17 = vector.shape_cast %16 : vector<1x32x32xbf16> to vector<32x32xbf16>
    %cst_19 = arith.constant dense<0.000000e+00> : vector<16x32xf32>
    %18 = tpu.matmul %8, %17, %cst_19 {dimension_numbers = #tpu.dot_dimension_numbers<[1], [0], [0], [1], [0, 0, 1, 1], [], []>} : vector<16x32xbf16>, vector<32x32xbf16>, vector<16x32xf32> -> vector<16x32xf32>
    %19 = arith.addf %15, %18 : vector<16x32xf32>
    %c0_20 = arith.constant 0 : index
    %c0_21 = arith.constant 0 : index
    %c0_22 = arith.constant 0 : index
    %20 = vector.load %arg9[%c0_20, %c0_21, %c0_22] : memref<3x4x32xbf16, #tpu.memory_space<vmem>>, vector<1x4x32xbf16>
    %21 = vector.shape_cast %20 : vector<1x4x32xbf16> to vector<4x32xbf16>
    %cst_23 = arith.constant dense<0.000000e+00> : vector<16x32xf32>
    %22 = tpu.matmul %10, %21, %cst_23 {dimension_numbers = #tpu.dot_dimension_numbers<[1], [0], [0], [1], [0, 0, 1, 1], [], []>} : vector<16x4xbf16>, vector<4x32xbf16>, vector<16x32xf32> -> vector<16x32xf32>
    %23 = arith.addf %19, %22 : vector<16x32xf32>
    %c0_24 = arith.constant 0 : index
    %c0_25 = arith.constant 0 : index
    %c0_26 = arith.constant 0 : index
    %24 = vector.load %arg11[%c0_24, %c0_25, %c0_26] : memref<3x1x32xf32, #tpu.memory_space<vmem>>, vector<1x1x32xf32>
    %25 = vector.shape_cast %24 : vector<1x1x32xf32> to vector<1x32xf32>
    %26 = vector.broadcast %25 : vector<1x32xf32> to vector<16x32xf32>
    %27 = arith.addf %23, %26 : vector<16x32xf32>
    %c0_27 = arith.constant 0 : index
    %c0_28 = arith.constant 0 : index
    %c0_29 = arith.constant 0 : index
    %28 = vector.load %arg10[%c0_27, %c0_28, %c0_29] : memref<3x32x32xbf16, #tpu.memory_space<vmem>>, vector<1x32x32xbf16>
    %29 = vector.shape_cast %28 : vector<1x32x32xbf16> to vector<32x32xbf16>
    %cst_30 = arith.constant dense<0.000000e+00> : vector<16x32xf32>
    %30 = tpu.matmul %12, %29, %cst_30 {dimension_numbers = #tpu.dot_dimension_numbers<[1], [0], [0], [1], [0, 0, 1, 1], [], []>} : vector<16x32xbf16>, vector<32x32xbf16>, vector<16x32xf32> -> vector<16x32xf32>
    %c0_31 = arith.constant 0 : index
    %c0_32 = arith.constant 0 : index
    %c0_33 = arith.constant 0 : index
    %31 = vector.load %arg12[%c0_31, %c0_32, %c0_33] : memref<3x1x32xf32, #tpu.memory_space<vmem>>, vector<1x1x32xf32>
    %32 = vector.shape_cast %31 : vector<1x1x32xf32> to vector<1x32xf32>
    %33 = vector.broadcast %32 : vector<1x32xf32> to vector<16x32xf32>
    %34 = arith.addf %30, %33 : vector<16x32xf32>
    %35 = arith.addf %27, %34 : vector<16x32xf32>
    %36 = arith.negf %35 : vector<16x32xf32>
    %37 = math.exp %36 : vector<16x32xf32>
    %cst_34 = arith.constant 1.000000e+00 : f32
    %38 = vector.broadcast %cst_34 : f32 to vector<16x32xf32>
    %39 = arith.addf %38, %37 : vector<16x32xf32>
    %40 = arith.divf %38, %39 : vector<16x32xf32>
    %c1 = arith.constant 1 : index
    %c0_35 = arith.constant 0 : index
    %c0_36 = arith.constant 0 : index
    %41 = vector.load %arg7[%c1, %c0_35, %c0_36] : memref<3x16x32xbf16, #tpu.memory_space<vmem>>, vector<1x16x32xbf16>
    %42 = vector.shape_cast %41 : vector<1x16x32xbf16> to vector<16x32xbf16>
    %cst_37 = arith.constant dense<0.000000e+00> : vector<16x32xf32>
    %43 = tpu.matmul %9, %42, %cst_37 {dimension_numbers = #tpu.dot_dimension_numbers<[1], [0], [0], [1], [0, 0, 1, 1], [], []>} : vector<16x16xbf16>, vector<16x32xbf16>, vector<16x32xf32> -> vector<16x32xf32>
    %c1_38 = arith.constant 1 : index
    %c0_39 = arith.constant 0 : index
    %c0_40 = arith.constant 0 : index
    %44 = vector.load %arg8[%c1_38, %c0_39, %c0_40] : memref<3x32x32xbf16, #tpu.memory_space<vmem>>, vector<1x32x32xbf16>
    %45 = vector.shape_cast %44 : vector<1x32x32xbf16> to vector<32x32xbf16>
    %cst_41 = arith.constant dense<0.000000e+00> : vector<16x32xf32>
    %46 = tpu.matmul %8, %45, %cst_41 {dimension_numbers = #tpu.dot_dimension_numbers<[1], [0], [0], [1], [0, 0, 1, 1], [], []>} : vector<16x32xbf16>, vector<32x32xbf16>, vector<16x32xf32> -> vector<16x32xf32>
    %47 = arith.addf %43, %46 : vector<16x32xf32>
    %c1_42 = arith.constant 1 : index
    %c0_43 = arith.constant 0 : index
    %c0_44 = arith.constant 0 : index
    %48 = vector.load %arg9[%c1_42, %c0_43, %c0_44] : memref<3x4x32xbf16, #tpu.memory_space<vmem>>, vector<1x4x32xbf16>
    %49 = vector.shape_cast %48 : vector<1x4x32xbf16> to vector<4x32xbf16>
    %cst_45 = arith.constant dense<0.000000e+00> : vector<16x32xf32>
    %50 = tpu.matmul %10, %49, %cst_45 {dimension_numbers = #tpu.dot_dimension_numbers<[1], [0], [0], [1], [0, 0, 1, 1], [], []>} : vector<16x4xbf16>, vector<4x32xbf16>, vector<16x32xf32> -> vector<16x32xf32>
    %51 = arith.addf %47, %50 : vector<16x32xf32>
    %c1_46 = arith.constant 1 : index
    %c0_47 = arith.constant 0 : index
    %c0_48 = arith.constant 0 : index
    %52 = vector.load %arg11[%c1_46, %c0_47, %c0_48] : memref<3x1x32xf32, #tpu.memory_space<vmem>>, vector<1x1x32xf32>
    %53 = vector.shape_cast %52 : vector<1x1x32xf32> to vector<1x32xf32>
    %54 = vector.broadcast %53 : vector<1x32xf32> to vector<16x32xf32>
    %55 = arith.addf %51, %54 : vector<16x32xf32>
    %c1_49 = arith.constant 1 : index
    %c0_50 = arith.constant 0 : index
    %c0_51 = arith.constant 0 : index
    %56 = vector.load %arg10[%c1_49, %c0_50, %c0_51] : memref<3x32x32xbf16, #tpu.memory_space<vmem>>, vector<1x32x32xbf16>
    %57 = vector.shape_cast %56 : vector<1x32x32xbf16> to vector<32x32xbf16>
    %cst_52 = arith.constant dense<0.000000e+00> : vector<16x32xf32>
    %58 = tpu.matmul %12, %57, %cst_52 {dimension_numbers = #tpu.dot_dimension_numbers<[1], [0], [0], [1], [0, 0, 1, 1], [], []>} : vector<16x32xbf16>, vector<32x32xbf16>, vector<16x32xf32> -> vector<16x32xf32>
    %c1_53 = arith.constant 1 : index
    %c0_54 = arith.constant 0 : index
    %c0_55 = arith.constant 0 : index
    %59 = vector.load %arg12[%c1_53, %c0_54, %c0_55] : memref<3x1x32xf32, #tpu.memory_space<vmem>>, vector<1x1x32xf32>
    %60 = vector.shape_cast %59 : vector<1x1x32xf32> to vector<1x32xf32>
    %61 = vector.broadcast %60 : vector<1x32xf32> to vector<16x32xf32>
    %62 = arith.addf %58, %61 : vector<16x32xf32>
    %63 = arith.addf %55, %62 : vector<16x32xf32>
    %64 = arith.negf %63 : vector<16x32xf32>
    %65 = math.exp %64 : vector<16x32xf32>
    %cst_56 = arith.constant 1.000000e+00 : f32
    %66 = vector.broadcast %cst_56 : f32 to vector<16x32xf32>
    %67 = arith.addf %66, %65 : vector<16x32xf32>
    %68 = arith.divf %66, %67 : vector<16x32xf32>
    %c2 = arith.constant 2 : index
    %c0_57 = arith.constant 0 : index
    %c0_58 = arith.constant 0 : index
    %69 = vector.load %arg7[%c2, %c0_57, %c0_58] : memref<3x16x32xbf16, #tpu.memory_space<vmem>>, vector<1x16x32xbf16>
    %70 = vector.shape_cast %69 : vector<1x16x32xbf16> to vector<16x32xbf16>
    %cst_59 = arith.constant dense<0.000000e+00> : vector<16x32xf32>
    %71 = tpu.matmul %9, %70, %cst_59 {dimension_numbers = #tpu.dot_dimension_numbers<[1], [0], [0], [1], [0, 0, 1, 1], [], []>} : vector<16x16xbf16>, vector<16x32xbf16>, vector<16x32xf32> -> vector<16x32xf32>
    %c2_60 = arith.constant 2 : index
    %c0_61 = arith.constant 0 : index
    %c0_62 = arith.constant 0 : index
    %72 = vector.load %arg8[%c2_60, %c0_61, %c0_62] : memref<3x32x32xbf16, #tpu.memory_space<vmem>>, vector<1x32x32xbf16>
    %73 = vector.shape_cast %72 : vector<1x32x32xbf16> to vector<32x32xbf16>
    %cst_63 = arith.constant dense<0.000000e+00> : vector<16x32xf32>
    %74 = tpu.matmul %8, %73, %cst_63 {dimension_numbers = #tpu.dot_dimension_numbers<[1], [0], [0], [1], [0, 0, 1, 1], [], []>} : vector<16x32xbf16>, vector<32x32xbf16>, vector<16x32xf32> -> vector<16x32xf32>
    %75 = arith.addf %71, %74 : vector<16x32xf32>
    %c2_64 = arith.constant 2 : index
    %c0_65 = arith.constant 0 : index
    %c0_66 = arith.constant 0 : index
    %76 = vector.load %arg9[%c2_64, %c0_65, %c0_66] : memref<3x4x32xbf16, #tpu.memory_space<vmem>>, vector<1x4x32xbf16>
    %77 = vector.shape_cast %76 : vector<1x4x32xbf16> to vector<4x32xbf16>
    %cst_67 = arith.constant dense<0.000000e+00> : vector<16x32xf32>
    %78 = tpu.matmul %10, %77, %cst_67 {dimension_numbers = #tpu.dot_dimension_numbers<[1], [0], [0], [1], [0, 0, 1, 1], [], []>} : vector<16x4xbf16>, vector<4x32xbf16>, vector<16x32xf32> -> vector<16x32xf32>
    %79 = arith.addf %75, %78 : vector<16x32xf32>
    %c2_68 = arith.constant 2 : index
    %c0_69 = arith.constant 0 : index
    %c0_70 = arith.constant 0 : index
    %80 = vector.load %arg11[%c2_68, %c0_69, %c0_70] : memref<3x1x32xf32, #tpu.memory_space<vmem>>, vector<1x1x32xf32>
    %81 = vector.shape_cast %80 : vector<1x1x32xf32> to vector<1x32xf32>
    %82 = vector.broadcast %81 : vector<1x32xf32> to vector<16x32xf32>
    %83 = arith.addf %79, %82 : vector<16x32xf32>
    %c2_71 = arith.constant 2 : index
    %c0_72 = arith.constant 0 : index
    %c0_73 = arith.constant 0 : index
    %84 = vector.load %arg10[%c2_71, %c0_72, %c0_73] : memref<3x32x32xbf16, #tpu.memory_space<vmem>>, vector<1x32x32xbf16>
    %85 = vector.shape_cast %84 : vector<1x32x32xbf16> to vector<32x32xbf16>
    %cst_74 = arith.constant dense<0.000000e+00> : vector<16x32xf32>
    %86 = tpu.matmul %12, %85, %cst_74 {dimension_numbers = #tpu.dot_dimension_numbers<[1], [0], [0], [1], [0, 0, 1, 1], [], []>} : vector<16x32xbf16>, vector<32x32xbf16>, vector<16x32xf32> -> vector<16x32xf32>
    %c2_75 = arith.constant 2 : index
    %c0_76 = arith.constant 0 : index
    %c0_77 = arith.constant 0 : index
    %87 = vector.load %arg12[%c2_75, %c0_76, %c0_77] : memref<3x1x32xf32, #tpu.memory_space<vmem>>, vector<1x1x32xf32>
    %88 = vector.shape_cast %87 : vector<1x1x32xf32> to vector<1x32xf32>
    %89 = vector.broadcast %88 : vector<1x32xf32> to vector<16x32xf32>
    %90 = arith.addf %86, %89 : vector<16x32xf32>
    %91 = arith.mulf %40, %90 : vector<16x32xf32>
    %92 = arith.addf %83, %91 : vector<16x32xf32>
    %93 = math.tanh %92 : vector<16x32xf32>
    %cst_78 = arith.constant 1.000000e+00 : f32
    %94 = vector.broadcast %cst_78 : f32 to vector<16x32xf32>
    %95 = arith.subf %94, %68 : vector<16x32xf32>
    %96 = arith.mulf %95, %93 : vector<16x32xf32>
    %97 = arith.mulf %68, %11 : vector<16x32xf32>
    %98 = arith.addf %96, %97 : vector<16x32xf32>
    %99 = tpu.concatenate %7, %98 in 1 : vector<16x32xf32>, vector<16x32xf32> -> vector<16x64xf32>
    %c0_79 = arith.constant 0 : index
    %c0_80 = arith.constant 0 : index
    %100 = vector.load %arg13[%c0_79, %c0_80] : memref<16x64xf32, #tpu.memory_space<vmem>>, vector<16x64xf32>
    tpu.vector_store %arg13[%c0_79, %c0_80], %99 {strides = array<i32>} : memref<16x64xf32, #tpu.memory_space<vmem>>, vector<16x64xf32>,
    return
  }
  func.func @transform_0(%arg0: i32) -> (i32, i32) {
    %c0_i32 = arith.constant 0 : i32
    %c0_i32_0 = arith.constant 0 : i32
    return %arg0, %c0_i32 : i32, i32
  }
  func.func @transform_1(%arg0: i32) -> (i32, i32) {
    %c0_i32 = arith.constant 0 : i32
    %c0_i32_0 = arith.constant 0 : i32
    return %arg0, %c0_i32 : i32, i32
  }
  func.func @transform_2(%arg0: i32) -> (i32, i32) {
    %c0_i32 = arith.constant 0 : i32
    %c0_i32_0 = arith.constant 0 : i32
    return %arg0, %c0_i32 : i32, i32
  }
  func.func @transform_3(%arg0: i32) -> (i32, i32) {
    %c0_i32 = arith.constant 0 : i32
    %c0_i32_0 = arith.constant 0 : i32
    return %arg0, %c0_i32 : i32, i32
  }
  func.func @transform_4(%arg0: i32) -> (i32, i32) {
    %c0_i32 = arith.constant 0 : i32
    %c0_i32_0 = arith.constant 0 : i32
    %c0_i32_1 = arith.constant 0 : i32
    return %c0_i32, %c0_i32_0 : i32, i32
  }
  func.func @transform_5(%arg0: i32) -> (i32, i32) {
    %c0_i32 = arith.constant 0 : i32
    %c0_i32_0 = arith.constant 0 : i32
    %c0_i32_1 = arith.constant 0 : i32
    return %c0_i32, %c0_i32_0 : i32, i32
  }
  func.func @transform_6(%arg0: i32) -> (i32, i32, i32) {
    %c0_i32 = arith.constant 0 : i32
    %c0_i32_0 = arith.constant 0 : i32
    %c0_i32_1 = arith.constant 0 : i32
    %c0_i32_2 = arith.constant 0 : i32
    return %c0_i32, %c0_i32_0, %c0_i32_1 : i32, i32, i32
  }
  func.func @transform_7(%arg0: i32) -> (i32, i32, i32) {
    %c0_i32 = arith.constant 0 : i32
    %c0_i32_0 = arith.constant 0 : i32
    %c0_i32_1 = arith.constant 0 : i32
    %c0_i32_2 = arith.constant 0 : i32
    return %c0_i32, %c0_i32_0, %c0_i32_1 : i32, i32, i32
  }
  func.func @transform_8(%arg0: i32) -> (i32, i32, i32) {
    %c0_i32 = arith.constant 0 : i32
    %c0_i32_0 = arith.constant 0 : i32
    %c0_i32_1 = arith.constant 0 : i32
    %c0_i32_2 = arith.constant 0 : i32
    return %c0_i32, %c0_i32_0, %c0_i32_1 : i32, i32, i32
  }
  func.func @transform_9(%arg0: i32) -> (i32, i32, i32) {
    %c0_i32 = arith.constant 0 : i32
    %c0_i32_0 = arith.constant 0 : i32
    %c0_i32_1 = arith.constant 0 : i32
    %c0_i32_2 = arith.constant 0 : i32
    return %c0_i32, %c0_i32_0, %c0_i32_1 : i32, i32, i32
  }
  func.func @transform_10(%arg0: i32) -> (i32, i32, i32) {
    %c0_i32 = arith.constant 0 : i32
    %c0_i32_0 = arith.constant 0 : i32
    %c0_i32_1 = arith.constant 0 : i32
    %c0_i32_2 = arith.constant 0 : i32
    return %c0_i32, %c0_i32_0, %c0_i32_1 : i32, i32, i32
  }
  func.func @transform_11(%arg0: i32) -> (i32, i32, i32) {
    %c0_i32 = arith.constant 0 : i32
    %c0_i32_0 = arith.constant 0 : i32
    %c0_i32_1 = arith.constant 0 : i32
    %c0_i32_2 = arith.constant 0 : i32
    return %c0_i32, %c0_i32_0, %c0_i32_1 : i32, i32, i32
  }
  func.func @transform_12(%arg0: i32) -> (i32, i32) {
    %c0_i32 = arith.constant 0 : i32
    %c0_i32_0 = arith.constant 0 : i32
    return %arg0, %c0_i32 : i32, i32
  }
}

</mosaic_0001>

<bundles_post_ra>
// kernel: tpu_custom_call.1
= control target key start
LH: loop header
LB: loop body
LE: loop exit
PB: predicated region body
PF: predicated region fallthrough
CT: control target
= control target key end

     0   :  { %17 = vsyncpa [#allocation3], 0  ;;  %s1776_s0 = inlined_call_operand.vmem [shape: bf16[16,8], index: 0, kind: input, shape index: {}]   ;;  %s1777_s1 = inlined_call_operand.hbm [shape: bf16[16,16], index: 1, kind: input, shape index: {}]   ;;  %s1778_s2 = inlined_call_operand.vmem [shape: bf16[16,4], index: 2, kind: input, shape index: {}]   ;;  %s1779_s3 = inlined_call_operand.hbm [shape: f32[16,32], index: 3, kind: input, shape index: {}]   ;;  %s1780_s4 = inlined_call_operand.hbm [shape: bf16[8,32], index: 4, kind: input, shape index: {}]   ;;  %s1781_s5 = inlined_call_operand.hbm [shape: f32[1,32], index: 5, kind: input, shape index: {}]   ;;  %s1782_s6 = inlined_call_operand.hbm [shape: bf16[3,16,32], index: 6, kind: input, shape index: {}]   ;;  %s1783_s7 = inlined_call_operand.vmem [shape: bf16[3,32,32], index: 7, kind: input, shape index: {}]   ;;  %s1784_s8 = inlined_call_operand.hbm [shape: bf16[3,4,32], index: 8, kind: input, shape index: {}]   ;;  %s1785_s9 = inlined_call_operand.hbm [shape: bf16[3,32,32], index: 9, kind: input, shape index: {}]   ;;  %s1786_s10 = inlined_call_operand.vmem [shape: f32[3,1,32], index: 10, kind: input, shape index: {}]   ;;  %s1787_s11 = inlined_call_operand.vmem [shape: f32[3,1,32], index: 11, kind: input, shape index: {}]   ;;  %s1788_s12 = inlined_call_operand.hbm [shape: f32[16,64], index: 12, kind: output, shape index: {}]  }
   0x1   :  { %18 = vsyncpa [#allocation6], 0 }
   0x2   :  { %19 = vsyncpa [#allocation9], 0 }
   0x3   :  { %20 = vsyncpa [#allocation12], 0 }
   0x4   :  { %21 = vsyncpa [#allocation4], 0  ;;  %s1447_s21 = smov [#allocation5]   ;;  %s1261_s25 = scalar_lea.hbm %s1779_s3, 256 }
   0x5   :  { %s43_s22 = sshll.u32 %s1447_s21, 4  ;;  %p1262_p0 = scmp.ne.s32.totalorder %s1779_s3, %s1261_s25  ;;  %s44_s22 = int_to_ptr.vmem [resolvable:$true] %s43_s22 }
   0x6   :  { %p1265_p1 = scmp.lt.u32.totalorder %s1261_s25, %s1779_s3 }
   0x8   :  { %p1267_p2 = pnand %p1265_p1, %p1262_p0 }
   0xa   :  { %1270 = shalt.err (!%p1267_p2)
}
   0xb   :  { %s1271_s30 = scalar_lea.vmem %s44_s22, 256  ;;  %p1276_p4 = scmp.lt.s32.totalorder %s44_s22, %s44_s22 }
   0xc   :  { %p1272_p3 = scmp.ne.s32.totalorder %s44_s22, %s1271_s30  ;;  %p1277_p5 = scmp.lt.s32.totalorder %s1271_s30, %s1271_s30 }
   0xe   :  { %p1278_p6 = por %p1277_p5, %p1276_p4 }
  0x10   :  { %p1279_p7 = pnand %p1278_p6, %p1272_p3 }
  0x12   :  { %1282 = shalt.err (!%p1279_p7)
}
  0x13   :  { %s1448_s13 = smov 128   ;;  %s1449_s14 = smov 8  }
  0x14   :  { %49 = dma.hbm_to_vmem [thread:$0]  %s1779_s3, 256, %s44_s22, [#allocation6], %s1448_s13, %s1448_s13, %s1449_s14  }
  0x15   :  { %s1450_s17 = smov [#allocation8]   ;;  %s1451_s19 = smov [#allocation11]  }
  0x16   :  { %s66_s18 = sshll.u32 %s1450_s17, 4  ;;  %s89_s20 = sshll.u32 %s1451_s19, 4  ;;  %s67_s18 = int_to_ptr.vmem [resolvable:$true] %s66_s18  ;;  %s90_s20 = int_to_ptr.vmem [resolvable:$true] %s89_s20 }
  0x17   :  { %s1283_s24 = scalar_lea.hbm %s1781_s5, 16 }
  0x18   :  { %p1284_p8 = scmp.ne.s32.totalorder %s1781_s5, %s1283_s24  ;;  %p1287_p9 = scmp.lt.u32.totalorder %s1283_s24, %s1781_s5 }
  0x1a   :  { %p1289_p10 = pnand %p1287_p9, %p1284_p8 }
  0x1c   :  { %1292 = shalt.err (!%p1289_p10)
}
  0x1d   :  { %s1293_s3 = scalar_lea.vmem %s67_s18, 16  ;;  %s1297_s22 = scalar_lea.vmem %s67_s18, 32 }
  0x1e   :  { %p1294_p11 = scmp.ne.s32.totalorder %s67_s18, %s1293_s3  ;;  %p1298_p12 = scmp.lt.s32.totalorder %s67_s18, %s67_s18 }
  0x1f   :  { %p1299_p13 = scmp.lt.s32.totalorder %s1297_s22, %s1293_s3 }
  0x21   :  { %p1300_p0 = por %p1299_p13, %p1298_p12 }
  0x23   :  { %p1301_p1 = pnand %p1300_p0, %p1294_p11 }
  0x25   :  { %1304 = shalt.err (!%p1301_p1)
}
  0x26   :  { %69 = dma.hbm_to_vmem [thread:$0]  %s1781_s5, 16, %s67_s18, [#allocation9]  }
  0x27   :  { %s1305_s17 = scalar_lea.hbm %s1784_s8, 96 }
  0x28   :  { %p1306_p2 = scmp.ne.s32.totalorder %s1784_s8, %s1305_s17  ;;  %p1309_p3 = scmp.lt.u32.totalorder %s1305_s17, %s1784_s8 }
  0x2a   :  { %p1311_p4 = pnand %p1309_p3, %p1306_p2 }
  0x2c   :  { %1314 = shalt.err (!%p1311_p4)
}
  0x2d   :  { %s1315_s25 = scalar_lea.vmem %s90_s20, 96  ;;  %p1320_p6 = scmp.lt.s32.totalorder %s90_s20, %s90_s20 }
  0x2e   :  { %p1316_p5 = scmp.ne.s32.totalorder %s90_s20, %s1315_s25  ;;  %p1321_p7 = scmp.lt.s32.totalorder %s1315_s25, %s1315_s25 }
  0x30   :  { %p1322_p8 = por %p1321_p7, %p1320_p6 }
  0x32   :  { %p1323_p9 = pnand %p1322_p8, %p1316_p5 }
  0x34   :  { %1326 = shalt.err (!%p1323_p9)
}
  0x35   :  { %s1452_s5 = smov 32   ;;  %s1453_s18 = smov 2  }
  0x36   :  { %95 = dma.hbm_to_vmem [thread:$0]  %s1784_s8, 96, %s90_s20, [#allocation12], %s1452_s5, %s1452_s5, %s1453_s18  }
  0x37   :  { %s1454_s28 = smov [#allocation2]   ;;  %s1327_s30 = scalar_lea.hbm %s1777_s1, 128 }
  0x38   :  { %s29_s3 = sshll.u32 %s1454_s28, 4  ;;  %p1328_p10 = scmp.ne.s32.totalorder %s1777_s1, %s1327_s30  ;;  %s30_s3 = int_to_ptr.vmem [resolvable:$true] %s29_s3 }
  0x39   :  { %p1331_p11 = scmp.lt.u32.totalorder %s1327_s30, %s1777_s1 }
  0x3b   :  { %p1333_p12 = pnand %p1331_p11, %p1328_p10 }
  0x3d   :  { %1336 = shalt.err (!%p1333_p12)
}
  0x3e   :  { %s1337_s21 = scalar_lea.vmem %s30_s3, 128  ;;  %p1342_p0 = scmp.lt.s32.totalorder %s30_s3, %s30_s3 }
  0x3f   :  { %p1338_p13 = scmp.ne.s32.totalorder %s30_s3, %s1337_s21  ;;  %p1343_p1 = scmp.lt.s32.totalorder %s1337_s21, %s1337_s21 }
  0x41   :  { %p1344_p2 = por %p1343_p1, %p1342_p0 }
  0x43   :  { %p1345_p3 = pnand %p1344_p2, %p1338_p13 }
  0x45   :  { %1348 = shalt.err (!%p1345_p3)
}
  0x46   :  { %s1455_s8 = smov 64   ;;  %s1456_s20 = smov 4  }
  0x47   :  { %35 = dma.hbm_to_vmem [thread:$0]  %s1777_s1, 128, %s30_s3, [#allocation3], %s1455_s8, %s1455_s8, %s1456_s20  }
  0x48   :  { %s1457_s25 = smov [#allocation7]   ;;  %s1458_s26 = smov [#allocation10]  }
  0x49   :  { %s56_s18 = sshll.u32 %s1457_s25, 4  ;;  %s75_s27 = sshll.u32 %s1458_s26, 4  ;;  %s57_s18 = int_to_ptr.vmem [resolvable:$true] %s56_s18  ;;  %s1584_s27 = int_to_ptr.vmem [resolvable:$true] %s75_s27 }
  0x4a   :  { %s1349_s29 = scalar_lea.hbm %s1780_s4, 64 }
  0x4b   :  { %p1350_p4 = scmp.ne.s32.totalorder %s1780_s4, %s1349_s29  ;;  %p1353_p5 = scmp.lt.u32.totalorder %s1349_s29, %s1780_s4 }
  0x4d   :  { %p1355_p6 = pnand %p1353_p5, %p1350_p4 }
  0x4f   :  { %1358 = shalt.err (!%p1355_p6)
}
  0x50   :  { %s1359_s1 = scalar_lea.vmem %s57_s18, 64  ;;  %p1364_p8 = scmp.lt.s32.totalorder %s57_s18, %s57_s18 }
  0x51   :  { %p1360_p7 = scmp.ne.s32.totalorder %s57_s18, %s1359_s1  ;;  %p1365_p9 = scmp.lt.s32.totalorder %s1359_s1, %s1359_s1 }
  0x53   :  { %p1366_p10 = por %p1365_p9, %p1364_p8 }
  0x55   :  { %p1367_p11 = pnand %p1366_p10, %p1360_p7 }
  0x57   :  { %1370 = shalt.err (!%p1367_p11)
}
  0x58   :  { %59 = dma.hbm_to_vmem [thread:$0]  %s1780_s4, 64, %s57_s18, [#allocation6]  }
  0x59   :  { %s1371_s24 = scalar_lea.hbm %s1782_s6, 384 }
  0x5a   :  { %p1372_p12 = scmp.ne.s32.totalorder %s1782_s6, %s1371_s24  ;;  %p1375_p13 = scmp.lt.u32.totalorder %s1371_s24, %s1782_s6 }
  0x5c   :  { %p1377_p0 = pnand %p1375_p13, %p1372_p12 }
  0x5e   :  { %1380 = shalt.err (!%p1377_p0)
}
  0x5f   :  { %s1381_s29 = scalar_lea.vmem %s1584_s27, 384  ;;  %p1386_p2 = scmp.lt.s32.totalorder %s1584_s27, %s1584_s27 }
  0x60   :  { %p1382_p1 = scmp.ne.s32.totalorder %s1584_s27, %s1381_s29  ;;  %p1387_p3 = scmp.lt.s32.totalorder %s1381_s29, %s1381_s29 }
  0x62   :  { %p1388_p4 = por %p1387_p3, %p1386_p2 }
  0x64   :  { %p1389_p5 = pnand %p1388_p4, %p1382_p1 }
  0x66   :  { %1392 = shalt.err (!%p1389_p5)
}
  0x67   :  { %81 = dma.hbm_to_vmem [thread:$0]  %s1782_s6, 384, %s1584_s27, [#allocation9], %s1455_s8, %s1455_s8, %s1456_s20  }
  0x68   :  { %s1459_s30 = smov [#allocation13]   ;;  %s1393_s1 = scalar_lea.hbm %s1785_s9, 768 }
  0x69   :  { %s101_s15 = sshll.u32 %s1459_s30, 4  ;;  %p1394_p6 = scmp.ne.s32.totalorder %s1785_s9, %s1393_s1  ;;  %s102_s15 = int_to_ptr.vmem [resolvable:$true] %s101_s15 }
  0x6a   :  { %p1397_p7 = scmp.lt.u32.totalorder %s1393_s1, %s1785_s9 }
  0x6c   :  { %p1399_p8 = pnand %p1397_p7, %p1394_p6 }
  0x6e   :  { %1402 = shalt.err (!%p1399_p8)
}
  0x6f   :  { %s1403_s24 = scalar_lea.vmem %s102_s15, 768  ;;  %p1408_p10 = scmp.lt.s32.totalorder %s102_s15, %s102_s15 }
  0x70   :  { %p1404_p9 = scmp.ne.s32.totalorder %s102_s15, %s1403_s24  ;;  %p1409_p11 = scmp.lt.s32.totalorder %s1403_s24, %s1403_s24 }
  0x72   :  { %p1410_p12 = por %p1409_p11, %p1408_p10 }
  0x74   :  { %p1411_p13 = pnand %p1410_p12, %p1404_p9 }
  0x76   :  { %1414 = shalt.err (!%p1411_p13)
}
  0x77   :  { %107 = dma.hbm_to_vmem [thread:$0]  %s1785_s9, 768, %s102_s15, [#allocation12], %s1455_s8, %s1455_s8, %s1456_s20  }
  0x78   :  { %1437 = dma.done.wait [#allocation3], 128  }
  0x79   :  { %1438 = vsyncadd [#allocation3], 4294967168 }
  0x7a   :  { %1439 = dma.done.wait [#allocation6], 320  }
  0x7b   :  { %1440 = vsyncadd [#allocation6], 4294966976 }
  0x7c   :  { %1441 = dma.done.wait [#allocation9], 400  }
  0x7d   :  { %1442 = vsyncadd [#allocation9], 4294966896 }
  0x7e   :  { %1443 = dma.done.wait [#allocation12], 864  }
  0x7f   :  { %1444 = vsyncadd [#allocation12], 4294966432  ;;  %v1460_v0 = vmov 0.0   ;;  %vm1461_vm0 = vmmov 0   ;;  %vm153_vm1 = vcmask 1043456   ;;  %v1223_v3 = vld [vmem:[%s1776_s0] sm:$0xff]  }
  0x80   :  { %1085 = vmatprep.subr.bf16.mxu0 %v1460_v0  ;;  %1087 = vmatprep.mubr.msk.bf16.mxu0 %vm1461_vm0, %v1460_v0  ;;  %v136_v1 = vld [vmem:[#allocation7] sm:$0xf]  ;;  %vm149_vm2 = vcmask 64512   ;;  %v1224_v4 = vld [vmem:[%s1783_s7] sm:$0xff]   ;;  %v1226_v6 = vld [vmem:[%s1783_s7 + $0x8] sm:$0xff]   ;;  %vm226_vm3 = vcmask 261120  }
  0x81   :  { %1091 = vmatprep.subr.bf16.mxu1 %v1460_v0  ;;  %1095 = vmatprep.mubr.msk.bf16.mxu1 %vm1461_vm0, %v1460_v0  ;;  %v155_v2 = vsel %vm153_vm1, %v136_v1, 0  ;;  %v1225_v5 = vld [vmem:[%s1783_s7 + $0x10] sm:$0xff]   ;;  %v1227_v7 = vld [vmem:[%s1783_s7 + $0x18] sm:$0xff]   ;;  %v327_v20 = vld [vmem:[#allocation11] sm:$0x3]  ;;  %vm337_vm4 = vcmask 1041408  }
  0x82   :  { %1086 = vmatpush3.bf16.msra.mxu0 %v155_v2  ;;  %1092 = vmatpush3.bf16.msra.mxu1 %v1224_v4  ;;  %v999_v8 = vld [vmem:[#allocation8] ss:$0 sm:$0xff]  ;;  %v1228_v17 = vld [vmem:[#allocation10] sm:$0xff]   ;;  %v1229_v18 = vld [vmem:[#allocation10 + $0x8] sm:$0xff]   ;;  %vm282_vm5 = vcmask 130048   ;;  %v339_v23 = vsel %vm337_vm4, %v327_v20, 0 }
  0x83   :  { %1119 = vmatprep.subr.bf16.mxu0 %v1460_v0  ;;  %1093 = vmatprep.subr.bf16.mxu1 %v1460_v0  ;;  %v583_v21 = vld [vmem:[#allocation11 + $0x2] sm:$0x3]  ;;  %v1230_v22 = vld [vmem:[#allocation2] sm:$0xff]   ;;  %v1231_v25 = vld [vmem:[%s1778_s2] sm:$0xff]   ;;  %vm333_vm6 = vcmask 31744   ;;  %vm976_vm7 = vcmask 523264  }
  0x84   :  { %v585_v24 = vsel %vm337_vm4, %v583_v21, 0  ;;  %v1232_v26 = vld [vmem:[#allocation13] sm:$0xff]   ;;  %v1233_v27 = vld [vmem:[#allocation13 + $0x10] sm:$0xff]   ;;  %v1234_v28 = vld [vmem:[#allocation13 + $0x8] sm:$0xff]  }
  0x85   :  { %1088 = vmatmul.mubr.msk.bf16.vlgmr.msra.gmra.mrb[0].mxu0 %vm149_vm2, %v1223_v3  ;;  %v1235_v29 = vld [vmem:[#allocation13 + $0x18] sm:$0xff]   ;;  %v1700_v30 = vld [vmem:[#allocation5] sm:$0xff]  ;;  %v1239_v38 = vld [vmem:[#allocation13 + $0x20] sm:$0xff]  }
  0x86   :  { %1123 = vmatprep.mubr.msk.bf16.mxu0 %vm1461_vm0, %v1460_v0  ;;  %1120 = vmatpush3.bf16.msra.mxu0 %v1225_v5  ;;  %v1702_v31 = vld [vmem:[#allocation5 + $0x8] sm:$0xff]  ;;  %v1236_v33 = vld [vmem:[%s1783_s7 + $0x20] sm:$0xff]   ;;  %v829_v36 = vld [vmem:[#allocation11 + $0x4] sm:$0x3] }
  0x87   :  { %1121 = vmatprep.subr.bf16.mxu0 %v1460_v0  ;;  %1094 = vmatpush3.bf16.msra.mxu1 %v1226_v6  ;;  %v207_v32 = vpack.c.bf16 %v1702_v31, %v1700_v30  ;;  %v1238_v34 = vld [vmem:[#allocation10 + $0x10] sm:$0xff]   ;;  %v831_v37 = vsel %vm337_vm4, %v829_v36, 0  ;;  %v1240_v39 = vld [vmem:[#allocation13 + $0x28] sm:$0xff]  }
  0x88   :  { %1099 = vmatprep.subr.bf16.mxu1 %v1460_v0  ;;  %v1237_v35 = vld [vmem:[%s1783_s7 + $0x28] sm:$0xff]   ;;  %v1010_v40 = vld [vmem:[%s1786_s10] ss:$0 sm:$0xff]  ;;  %v1028_v43 = vld [vmem:[%s1786_s10 + $0x1] ss:$0 sm:$0xff] }
  0x89   :  { %v1011_v41 = vld [vmem:[%s1787_s11] ss:$0 sm:$0xff]  ;;  %v1030_v44 = vld [vmem:[%s1787_s11 + $0x1] ss:$0 sm:$0xff] }
  0x8a   :  { %1122 = vmatpush3.bf16.msra.mxu0 %v1227_v7  ;;  %v1175_v42 = vadd.f32 %v1011_v41, %v1010_v40  ;;  %v1179_v47 = vadd.f32 %v1030_v44, %v1028_v43 }
  0x8b   :  { %1127 = vmatprep.subr.bf16.mxu0 %v1460_v0 }
 0x158   :  { %v191_v9 = vpop.f32.mrb[0].mxu0 }
 0x159   :  { %v1661_v10 = vadd.f32 %v999_v8, %v191_v9  ;;  %v1089_v11 = vpop.f32.mrb[1].mxu0 }
 0x15a   :  { %v194_v12 = vpop.f32.mrb[2].mxu0 }
 0x15b   :  { %v1663_v13 = vadd.f32 %v999_v8, %v194_v12  ;;  %v1090_v14 = vpop.f32.mrb[3].mxu0  ;;  %v198_v15 = vmax.f32 %v1661_v10, 0.0 }
 0x15d   :  { %v199_v16 = vmax.f32 %v1663_v13, 0.0 }
 0x15f   :  { %v200_v19 = vpack.c.bf16 %v199_v16, %v198_v15 }
 0x161   :  { %1096 = vmatmul.mubr.msk.bf16.vlgmr.msra.gmra.mrb[0].mxu1 %vm226_vm3, %v200_v19  ;;  %1124 = vmatmul.mubr.msk.bf16.vlgmr.msra.gmra.mrb[4].mxu0 %vm226_vm3, %v200_v19 }
 0x162   :  { %1100 = vmatpush3.bf16.msra.mxu1 %v1228_v17  ;;  %1128 = vmatpush3.bf16.msra.mxu0 %v1229_v18 }
 0x163   :  { %1101 = vmatprep.mubr.msk.bf16.mxu1 %vm1461_vm0, %v1460_v0  ;;  %1105 = vmatprep.subr.bf16.mxu1 %v1460_v0 }
 0x164   :  { %1129 = vmatprep.mubr.msk.bf16.mxu0 %vm1461_vm0, %v1460_v0  ;;  %1133 = vmatprep.subr.bf16.mxu0 %v1460_v0 }
 0x16d   :  { %1102 = vmatmul.mubr.msk.bf16.vlgmr.msra.gmra.mrb[0].mxu1 %vm282_vm5, %v1230_v22  ;;  %1130 = vmatmul.mubr.msk.bf16.vlgmr.msra.gmra.mrb[4].mxu0 %vm282_vm5, %v1230_v22 }
 0x16e   :  { %1106 = vmatpush3.bf16.msra.mxu1 %v339_v23  ;;  %1134 = vmatpush3.bf16.msra.mxu0 %v585_v24 }
 0x16f   :  { %1107 = vmatprep.mubr.msk.bf16.mxu1 %vm1461_vm0, %v1460_v0  ;;  %1111 = vmatprep.subr.bf16.mxu1 %v1460_v0 }
 0x170   :  { %1135 = vmatprep.mubr.msk.bf16.mxu0 %vm1461_vm0, %v1460_v0  ;;  %1139 = vmatprep.subr.bf16.mxu0 %v1460_v0 }
 0x179   :  { %1108 = vmatmul.mubr.msk.bf16.vlgmr.msra.gmra.mrb[0].mxu1 %vm333_vm6, %v1231_v25  ;;  %1136 = vmatmul.mubr.msk.bf16.vlgmr.msra.gmra.mrb[4].mxu0 %vm333_vm6, %v1231_v25 }
 0x17a   :  { %1112 = vmatpush3.bf16.msra.mxu1 %v1232_v26  ;;  %1140 = vmatpush3.bf16.msra.mxu0 %v1233_v27  ;;  %v1049_v27 = vld [vmem:[%s1787_s11 + $0x2] ss:$0 sm:$0xff] }
 0x17b   :  { %1113 = vmatprep.subr.bf16.mxu1 %v1460_v0  ;;  %1141 = vmatprep.subr.bf16.mxu0 %v1460_v0 }
 0x17c   :  { %1115 = vmatprep.mubr.msk.bf16.mxu1 %vm1461_vm0, %v1460_v0  ;;  %1143 = vmatprep.mubr.msk.bf16.mxu0 %vm1461_vm0, %v1460_v0 }
 0x17e   :  { %1114 = vmatpush3.bf16.msra.mxu1 %v1234_v28  ;;  %1142 = vmatpush3.bf16.msra.mxu0 %v1235_v29 }
 0x17f   :  { %1147 = vmatprep.subr.bf16.mxu1 %v1460_v0  ;;  %1155 = vmatprep.subr.bf16.mxu0 %v1460_v0 }
 0x185   :  { %1116 = vmatmul.mubr.msk.bf16.vlgmr.msra.gmra.mrb[0].mxu1 %vm226_vm3, %v207_v32  ;;  %1144 = vmatmul.mubr.msk.bf16.vlgmr.msra.gmra.mrb[4].mxu0 %vm226_vm3, %v207_v32 }
 0x186   :  { %1148 = vmatpush3.bf16.msra.mxu1 %v1236_v33  ;;  %1156 = vmatpush3.bf16.msra.mxu0 %v1238_v34  ;;  %v1047_v33 = vld [vmem:[%s1786_s10 + $0x2] ss:$0 sm:$0xff]  ;;  %s1462_s10 = smov [#allocation14]  }
 0x187   :  { %1149 = vmatprep.subr.bf16.mxu1 %v1460_v0  ;;  %1151 = vmatprep.mubr.msk.bf16.mxu1 %vm1461_vm0, %v1460_v0  ;;  %s984_s11 = sshll.u32 %s1462_s10, 4  ;;  %s985_s11 = int_to_ptr.vmem [resolvable:$true] %s984_s11 }
 0x188   :  { %1157 = vmatprep.mubr.msk.bf16.mxu0 %vm1461_vm0, %v1460_v0  ;;  %1167 = vmatprep.subr.bf16.mxu0 %v1460_v0  ;;  %s1415_s25 = scalar_lea.vmem %s985_s11, 256  ;;  %p1420_p1 = scmp.lt.s32.totalorder %s985_s11, %s985_s11 }
 0x189   :  { %p1416_p0 = scmp.ne.s32.totalorder %s985_s11, %s1415_s25  ;;  %p1421_p2 = scmp.lt.s32.totalorder %s1415_s25, %s1415_s25 }
 0x18a   :  { %1150 = vmatpush3.bf16.msra.mxu1 %v1237_v35 }
 0x18b   :  { %1161 = vmatprep.subr.bf16.mxu1 %v1460_v0  ;;  %p1422_p3 = por %p1421_p2, %p1420_p1 }
 0x18d   :  { %1152 = vmatmul.mubr.msk.bf16.vlgmr.msra.gmra.mrb[4].mxu1 %vm226_vm3, %v200_v19  ;;  %1158 = vmatmul.mubr.msk.bf16.vlgmr.msra.gmra.mrb[8].mxu0 %vm282_vm5, %v1230_v22  ;;  %p1423_p4 = pnand %p1422_p3, %p1416_p0 }
 0x18e   :  { %1162 = vmatpush3.bf16.msra.mxu1 %v831_v37  ;;  %1163 = vmatprep.mubr.msk.bf16.mxu1 %vm1461_vm0, %v1460_v0 }
 0x18f   :  { %1168 = vmatpush3.bf16.msra.mxu0 %v1239_v38  ;;  %1171 = vmatprep.mubr.msk.bf16.mxu0 %vm1461_vm0, %v1460_v0 }
 0x190   :  { %1169 = vmatprep.subr.bf16.mxu0 %v1460_v0 }
 0x193   :  { %1170 = vmatpush3.bf16.msra.mxu0 %v1240_v39 }
 0x195   :  { %1164 = vmatmul.mubr.msk.bf16.vlgmr.msra.gmra.mrb[8].mxu1 %vm333_vm6, %v1231_v25 }
 0x196   :  { %1172 = vmatmul.mubr.msk.bf16.vlgmr.msra.gmra.mrb[12].mxu0 %vm226_vm3, %v207_v32 }
 0x258   :  { %v453_v45 = vpop.f32.mrb[0].mxu1  ;;  %v699_v46 = vpop.f32.mrb[4].mxu0 }
 0x259   :  { %v1176_v48 = vadd.f32 %v1175_v42, %v453_v45  ;;  %v1117_v49 = vpop.f32.mrb[1].mxu1  ;;  %v1145_v50 = vpop.f32.mrb[5].mxu0  ;;  %v1180_v57 = vadd.f32 %v1179_v47, %v699_v46 }
 0x25a   :  { %v456_v51 = vpop.f32.mrb[2].mxu1  ;;  %v702_v52 = vpop.f32.mrb[6].mxu0 }
 0x25b   :  { %v1015_v53 = vmul.f32 -1.442695, %v1176_v48  ;;  %v1178_v54 = vadd.f32 %v1175_v42, %v456_v51  ;;  %v1118_v55 = vpop.f32.mrb[3].mxu1  ;;  %v1146_v56 = vpop.f32.mrb[7].mxu0  ;;  %v1182_v59 = vadd.f32 %v1179_v47, %v702_v52  ;;  %v1034_v60 = vmul.f32 -1.442695, %v1180_v57 }
 0x25d   :  { %1241 = vpow2.f32 %v1015_v53  ;;  %v1016_v58 = vmul.f32 -1.442695, %v1178_v54  ;;  %v1035_v2 = vmul.f32 -1.442695, %v1182_v59 }
 0x25f   :  { %1243 = vpow2.f32 %v1016_v58 }
 0x260   :  { %v774_v61 = vpop.f32.mrb[4].mxu1  ;;  %v821_v62 = vpop.f32.mrb[8].mxu0  ;;  %1245 = vpow2.f32 %v1034_v60 }
 0x261   :  { %v822_v63 = vadd.f32 %v821_v62, %v774_v61  ;;  %v1153_v0 = vpop.f32.mrb[5].mxu1  ;;  %v1159_v1 = vpop.f32.mrb[9].mxu0  ;;  %1247 = vpow2.f32 %v1035_v2 }
 0x262   :  { %v777_v3 = vpop.f32.mrb[6].mxu1  ;;  %v824_v4 = vpop.f32.mrb[10].mxu0 }
 0x263   :  { %v825_v5 = vadd.f32 %v824_v4, %v777_v3  ;;  %v1154_v6 = vpop.f32.mrb[7].mxu1  ;;  %v1160_v7 = vpop.f32.mrb[11].mxu0 }
 0x267   :  { %v1242_v8 = vpop.eup %1241 }
 0x268   :  { %v468_v9 = vadd.f32 1.0, %v1242_v8  ;;  %v867_v11 = vpop.f32.mrb[8].mxu1 }
 0x269   :  { %v1244_v12 = vpop.eup %1243  ;;  %v874_v14 = vadd.f32 %v867_v11, %v822_v63  ;;  %v1165_v17 = vpop.f32.mrb[9].mxu1 }
 0x26a   :  { %v945_v18 = vpop.f32.mrb[12].mxu0  ;;  %1249 = vrcp.f32 %v468_v9  ;;  %v469_v19 = vadd.f32 1.0, %v1244_v12  ;;  %v870_v20 = vpop.f32.mrb[10].mxu1 }
 0x26b   :  { %v1173_v21 = vpop.f32.mrb[13].mxu0  ;;  %v875_v22 = vadd.f32 %v870_v20, %v825_v5  ;;  %v1166_v24 = vpop.f32.mrb[11].mxu1  ;;  %v946_v32 = vadd.f32 %v1049_v27, %v945_v18  ;;  %v884_v36 = vadd.f32 %v1047_v33, %v874_v14 }
 0x26c   :  { %v948_v23 = vpop.f32.mrb[14].mxu0  ;;  %1251 = vrcp.f32 %v469_v19  ;;  %v1246_v26 = vpop.eup %1245 }
 0x26d   :  { %v1174_v25 = vpop.f32.mrb[15].mxu0  ;;  %v1248_v28 = vpop.eup %1247  ;;  %v714_v29 = vadd.f32 1.0, %v1246_v26  ;;  %v949_v38 = vadd.f32 %v1049_v27, %v948_v23  ;;  %v885_v40 = vadd.f32 %v1047_v33, %v875_v22 }
 0x26e   :  { %v715_v34 = vadd.f32 1.0, %v1248_v28 }
 0x26f   :  { %1253 = vrcp.f32 %v714_v29 }
 0x270   :  { %1255 = vrcp.f32 %v715_v34 }
 0x274   :  { %v1250_v35 = vpop.eup %1249 }
 0x275   :  { %v952_v37 = vmul.f32 %v1250_v35, %v946_v32 }
 0x276   :  { %v1252_v39 = vpop.eup %1251 }
 0x277   :  { %v954_v41 = vadd.f32 %v952_v37, %v884_v36  ;;  %v953_v42 = vmul.f32 %v1252_v39, %v949_v38 }
 0x279   :  { %1257 = vtanh.f32 %v954_v41  ;;  %v955_v43 = vadd.f32 %v953_v42, %v885_v40  ;;  %v1254_v44 = vpop.eup %1253 }
 0x27a   :  { %v1256_v45 = vpop.eup %1255  ;;  %v958_v46 = vsub.f32 1.0, %v1254_v44  ;;  %v962_v49 = vmul.f32 %v1254_v44, %v1700_v30 }
 0x27b   :  { %1259 = vtanh.f32 %v955_v43  ;;  %v959_v50 = vsub.f32 1.0, %v1256_v45  ;;  %v963_v54 = vmul.f32 %v1256_v45, %v1702_v31 }
 0x283   :  { %v1258_v47 = vpop.eup %1257 }
 0x284   :  { %v960_v48 = vmul.f32 %v1258_v47, %v958_v46 }
 0x285   :  { %v1260_v51 = vpop.eup %1259 }
 0x286   :  { %v964_v52 = vadd.f32 %v962_v49, %v960_v48  ;;  %v961_v53 = vmul.f32 %v1260_v51, %v959_v50 }
 0x288   :  { %968 = vrot.lane.b32.xlu0 %v964_v52, %s1452_s5  ;;  %v965_v55 = vadd.f32 %v963_v54, %v961_v53 }
 0x28c   :  { %970 = vrot.lane.b32.xlu0 %v965_v55, %s1452_s5 }
 0x2fa   :  { %v969_v56 = vpop.permute.xlu0 %968 }
 0x2fb   :  { %v974_v57 = vsel %vm226_vm3, %v198_v15, %v969_v56 }
 0x2fc   :  { %977 = vst.msk [vmem:[#allocation14] sm:$0xff] %vm976_vm7, %v974_v57 }
 0x2fe   :  { %v971_v30 = vpop.permute.xlu0 %970 }
 0x2ff   :  { %v975_v31 = vsel %vm226_vm3, %v199_v16, %v971_v30 }
 0x300   :  { %978 = vst.msk [vmem:[#allocation14 + $0x8] sm:$0xff] %vm976_vm7, %v975_v31 }
 0x301   :  { %1426 = shalt.err (!%p1423_p4)
}
 0x302   :  { %s1427_s28 = scalar_lea.hbm %s1788_s12, 256 }
 0x303   :  { %p1428_p5 = scmp.ne.s32.totalorder %s1788_s12, %s1427_s28  ;;  %p1431_p6 = scmp.lt.u32.totalorder %s1427_s28, %s1788_s12 }
 0x305   :  { %p1433_p7 = pnand %p1431_p6, %p1428_p5 }
 0x307   :  { %1436 = shalt.err (!%p1433_p7)
}
 0x308   :  { %990 = dma.vmem_to_hbm [thread:$0]  %s985_s11, 256, %s1788_s12, [#allocation4], %s1448_s13, %s1448_s13, %s1449_s14  }
 0x309   :  { %1445 = dma.done.wait [#allocation4], 256  }
 0x30a   :  { %1446 = vsyncadd [#allocation4], 4294967040 }
 0x30b   :  { %994 = vsyncpa [#allocation3], 1 }
 0x30c   :  { %995 = vsyncpa [#allocation6], 1 }
 0x30d   :  { %996 = vsyncpa [#allocation9], 1 }
 0x30e   :  { %997 = vsyncpa [#allocation12], 1 }
 0x30f   :  { %998 = vsyncpa [#allocation4], 1 }

</bundles_post_ra>
